<compile_context>
chip_gen: v6e
topology: v6e:2x2x1
jax: 0.10.0
libtpu: 0.0.40
codegen_flags: <defaults>
</compile_context>

<pallas_src>
import functools

import jax
import jax.numpy as jnp
from jax.experimental import pallas as pl
from jax.experimental.pallas import tpu as pltpu


# ---------------------------------------------------------------------------
# Kernel
# ---------------------------------------------------------------------------
def residual_block_kernel(x_ref, w1_ref, b1_ref, w2_ref, b2_ref, o_ref):
    # y = relu(x + (relu(x @ W1^T + b1) @ W2^T + b2))
    x = x_ref[...]                                   # (tb, D), activation dtype
    xf = x.astype(jnp.float32)                       # residual in f32
    wdt = w1_ref.dtype                               # bf16 (default) or f32

    h = jnp.dot(x.astype(wdt), w1_ref[...],
                preferred_element_type=jnp.float32) + b1_ref[...]
    h = jnp.maximum(h, 0.0)                          # ReLU (f32, VPU)

    y = jnp.dot(h.astype(wdt), w2_ref[...],
                preferred_element_type=jnp.float32) + b2_ref[...]

    o_ref[...] = jnp.maximum(xf + y, 0.0).astype(o_ref.dtype)


# ---------------------------------------------------------------------------
# One-time parameter prep (load time, not per call)
# ---------------------------------------------------------------------------
def prepare_residual_block_params(w1, b1, w2, b2, *, weight_dtype=jnp.bfloat16):
    """Transpose PyTorch (out, in) weights and cast for the MXU.

    weight_dtype=jnp.bfloat16 (default) halves weight bytes and runs the fast
    MXU path (~1e-2 relative error vs f32 PyTorch); pass jnp.float32 for
    strict parity.
    """
    def prep_w(w):  # (out, in) -> W^T  (in, out)
        return jnp.asarray(w, jnp.float32).T.astype(weight_dtype)

    def prep_b(b):  # (d,) -> (1, d) f32
        return jnp.asarray(b, jnp.float32).reshape(1, -1)

    return prep_w(w1), prep_b(b1), prep_w(w2), prep_b(b2)


# ---------------------------------------------------------------------------
# Helpers
# ---------------------------------------------------------------------------
@functools.cache
def _buffered_mode_supported():
    """One-time feature probe: does this jax build accept pipeline_mode=pl.Buffered(1)?

    This narrow probe replaces the old broad try/except around the real kernel,
    so genuine compile errors (VMEM OOM, lowering failures) are never masked.
    """
    def _probe_kernel(x_ref, o_ref):
        o_ref[...] = x_ref[...]

    try:
        probe = pl.pallas_call(
            _probe_kernel,
            out_shape=jax.ShapeDtypeStruct((8, 128), jnp.float32),
            grid=(1,),
            in_specs=[pl.BlockSpec((8, 128), lambda i: (0, 0),
                                   pipeline_mode=pl.Buffered(1))],
            out_specs=pl.BlockSpec((8, 128), lambda i: (0, 0)),
        )
        jax.block_until_ready(probe(jnp.zeros((8, 128), jnp.float32)))
        return True
    except Exception:
        return False


def _vmem_capacity_bytes():
    """Physical VMEM of the current generation (64 MiB v7x, 128 MiB v5e/v6e)."""
    try:
        info = pltpu.get_tpu_info()
        cap = getattr(info, "vmem_capacity_bytes", None)
        if cap:
            return int(cap)
    except Exception:
        pass
    return 64 << 20  # conservative default (v7x per-TC size)


def _choose_tb(B, *, max_tb=256):
    """Batch tile: multiple of 8 that divides B, capped so that
    - grid >= 2 steps once B >= 16 (v7x dual-TC sharding),
    - grid >= 4 steps once B >= 1024 (DMA/compute overlap)."""
    if B % 8 != 0:
        return B  # single full-extent tile (second-last dim == full array dim)
    cap = min(max_tb, B)
    if B >= 16:
        cap = min(cap, B // 2)
    if B >= 1024:
        cap = min(cap, B // 4)
    best = 8
    d = 8
    while d <= cap:
        if B % d == 0:
            best = d
        d += 8
    return best


def _residual_block_xla(x, prepared_params):
    """Small-problem escape hatch: plain XLA for tiny shapes."""
    w1t, b1, w2t, b2 = prepared_params
    xf = x.astype(jnp.float32)
    h = jnp.maximum(xf @ w1t.astype(jnp.float32) + b1[0], 0.0)
    y = h @ w2t.astype(jnp.float32) + b2[0]
    return jnp.maximum(xf + y, 0.0).astype(x.dtype)


def _build_call(B, D, tb, act_dtype, weight_dtype, *, single_buffer_weights,
                interpret=False):
    n_tiles = B // tb
    const_map = lambda i: (0, 0)
    w_kwargs = {"pipeline_mode": pl.Buffered(1)} if single_buffer_weights else {}

    in_specs = [
        pl.BlockSpec((tb, D), lambda i: (i, 0)),        # x tile over batch
        pl.BlockSpec((D, D), const_map, **w_kwargs),    # W1^T (resident)
        pl.BlockSpec((1, D), const_map, **w_kwargs),    # b1 (f32)
        pl.BlockSpec((D, D), const_map, **w_kwargs),    # W2^T (resident)
        pl.BlockSpec((1, D), const_map, **w_kwargs),    # b2 (f32)
    ]
    out_spec = pl.BlockSpec((tb, D), lambda i: (i, 0))

    act_bytes = jnp.dtype(act_dtype).itemsize
    w_bytes = jnp.dtype(weight_dtype).itemsize
    n_wbuf = 1 if single_buffer_weights else 2
    vmem_needed = (
        n_wbuf * (2 * D * D * w_bytes + 2 * D * 4)      # resident weights + biases
        + 2 * 2 * tb * D * act_bytes                    # x / out tiles, double-buffered
        + 3 * tb * D * 4                                # h / y / residual f32 temps
    )
    cap = _vmem_capacity_bytes()
    vmem_limit = min(max(int(vmem_needed * 1.5) + (4 << 20), 32 << 20),
                     (cap * 3) // 4)

    flops = 2 * 2 * B * D * D                           # two (tb,D)x(D,D) matmuls per tile
    bytes_accessed = (2 * B * D * act_bytes             # x in + out
                      + 2 * D * D * w_bytes             # weights
                      + 2 * D * 4)                      # biases

    return pl.pallas_call(
        residual_block_kernel,
        out_shape=jax.ShapeDtypeStruct((B, D), act_dtype),
        grid_spec=pltpu.PrefetchScalarGridSpec(
            num_scalar_prefetch=0,
            grid=(n_tiles,),
            in_specs=in_specs,
            out_specs=out_spec,
        ),
        compiler_params=pltpu.CompilerParams(
            dimension_semantics=("parallel",),          # batch tiles shard across TCs
            vmem_limit_bytes=vmem_limit,
        ),
        cost_estimate=pl.CostEstimate(
            flops=flops, transcendentals=0, bytes_accessed=bytes_accessed),
        interpret=interpret,
    )


# ---------------------------------------------------------------------------
# Public entry point
# ---------------------------------------------------------------------------
_SMALL_PROBLEM_FLOPS = 1 << 20  # below ~1e6 MACs, dispatch overhead dominates


def residual_block(x, prepared_params, *, max_tb=256, force_pallas=False,
                   interpret=False):
    """x: (B, D) float32 or bfloat16. prepared_params from prepare_residual_block_params."""
    w1t, b1r, w2t, b2r = prepared_params
    B, D = x.shape
    assert w1t.shape == (D, D) and w2t.shape == (D, D)

    if not force_pallas and B * D * D < _SMALL_PROBLEM_FLOPS:
        return _residual_block_xla(x, prepared_params)

    tb = _choose_tb(B, max_tb=max_tb)
    call = _build_call(B, D, tb, x.dtype, w1t.dtype,
                       single_buffer_weights=_buffered_mode_supported(),
                       interpret=interpret)
    return call(x, w1t, b1r, w2t, b2r)


def residual_block_ref(x, w1, b1, w2, b2):
    # Pure-JAX reference matching PyTorch semantics (f32 throughout).
    h = jnp.maximum(x @ w1.T + b1, 0.0)
    y = h @ w2.T + b2
    return jnp.maximum(x + y, 0.0)


# ---------------------------------------------------------------------------
# Self-test
# ---------------------------------------------------------------------------
if __name__ == "__main__":
    batch, dim = 16, 32
    key = jax.random.PRNGKey(0)
    kx, k1, k2, k3, k4 = jax.random.split(key, 5)

    x = jax.random.normal(kx, (batch, dim), dtype=jnp.float32)
    # PyTorch Linear shapes: weight (out, in), bias (out,).
    bound = 1.0 / (dim ** 0.5)
    w1 = jax.random.uniform(k1, (dim, dim), minval=-bound, maxval=bound, dtype=jnp.float32)
    b1 = jax.random.uniform(k2, (dim,), minval=-bound, maxval=bound, dtype=jnp.float32)
    w2 = jax.random.uniform(k3, (dim, dim), minval=-bound, maxval=bound, dtype=jnp.float32)
    b2 = jax.random.uniform(k4, (dim,), minval=-bound, maxval=bound, dtype=jnp.float32)

    # One-time parameter prep (transpose + bf16 cast), hoisted out of the call path.
    params = prepare_residual_block_params(w1, b1, w2, b2)

    # force_pallas=True so the tiny test shape exercises the Pallas kernel
    # (production default would take the XLA escape hatch at this size).
    out = residual_block(x, params, force_pallas=True)
    out = jax.block_until_ready(out)

    ref = residual_block_ref(x, w1, b1, w2, b2)
    assert out.shape == (batch, dim)
    # bf16 MXU operands with f32 accumulation -> looser tolerance than pure f32
    # (use prepare_residual_block_params(..., weight_dtype=jnp.float32) for parity).
    err = float(jnp.max(jnp.abs(out - ref)))
    assert jnp.allclose(out, ref, atol=2e-2, rtol=2e-2), f"max abs err {err}"
    print("KERNEL_OK")
</pallas_src>

<mosaic_0001>
module attributes {stable_mosaic.version = 11 : i64} {
  func.func @_probe_kernel(%arg0: i32, %arg1: memref<8x128xf32, #tpu.memory_space<vmem>>, %arg2: memref<8x128xf32, #tpu.memory_space<vmem>>) attributes {dimension_semantics = [#tpu.dimension_semantics<arbitrary>], iteration_bounds = array<i64: 1>, scalar_prefetch = 0 : i64, scratch_operands = 0 : i64, tpu.core_type = #tpu.core_type<tc>, window_params = [{pipeline_mode = #tpu.pipeline_mode<synchronous>, transform_indices = @transform_0, window_bounds = array<i64: 8, 128>}, {pipeline_mode = #tpu.pipeline_mode<synchronous>, transform_indices = @transform_1, window_bounds = array<i64: 8, 128>}]} {
    %c0 = arith.constant 0 : index
    %c0_0 = arith.constant 0 : index
    %0 = vector.load %arg1[%c0, %c0_0] : memref<8x128xf32, #tpu.memory_space<vmem>>, vector<8x128xf32>
    %c0_1 = arith.constant 0 : index
    %c0_2 = arith.constant 0 : index
    %1 = vector.load %arg2[%c0_1, %c0_2] : memref<8x128xf32, #tpu.memory_space<vmem>>, vector<8x128xf32>
    tpu.vector_store %arg2[%c0_1, %c0_2], %0 {strides = array<i32>} : memref<8x128xf32, #tpu.memory_space<vmem>>, vector<8x128xf32>,
    return
  }
  func.func @transform_0(%arg0: i32) -> (i32, i32) {
    %c0_i32 = arith.constant 0 : i32
    %c0_i32_0 = arith.constant 0 : i32
    %c0_i32_1 = arith.constant 0 : i32
    return %c0_i32, %c0_i32_0 : i32, i32
  }
  func.func @transform_1(%arg0: i32) -> (i32, i32) {
    %c0_i32 = arith.constant 0 : i32
    %c0_i32_0 = arith.constant 0 : i32
    %c0_i32_1 = arith.constant 0 : i32
    return %c0_i32, %c0_i32_0 : i32, i32
  }
}

module attributes {stable_mosaic.version = 11 : i64} {
  func.func @residual_block_kernel(%arg0: i32, %arg1: memref<8x32xf32, #tpu.memory_space<vmem>>, %arg2: memref<32x32xbf16, #tpu.memory_space<vmem>>, %arg3: memref<1x32xf32, #tpu.memory_space<vmem>>, %arg4: memref<32x32xbf16, #tpu.memory_space<vmem>>, %arg5: memref<1x32xf32, #tpu.memory_space<vmem>>, %arg6: memref<8x32xf32, #tpu.memory_space<vmem>>) attributes {dimension_semantics = [#tpu.dimension_semantics<parallel>], iteration_bounds = array<i64: 2>, scalar_prefetch = 0 : i64, scratch_operands = 0 : i64, tpu.core_type = #tpu.core_type<tc>, window_params = [{transform_indices = @transform_0, window_bounds = array<i64: 8, 32>}, {pipeline_mode = #tpu.pipeline_mode<synchronous>, transform_indices = @transform_1, window_bounds = array<i64: 32, 32>}, {pipeline_mode = #tpu.pipeline_mode<synchronous>, transform_indices = @transform_2, window_bounds = array<i64: 1, 32>}, {pipeline_mode = #tpu.pipeline_mode<synchronous>, transform_indices = @transform_3, window_bounds = array<i64: 32, 32>}, {pipeline_mode = #tpu.pipeline_mode<synchronous>, transform_indices = @transform_4, window_bounds = array<i64: 1, 32>}, {transform_indices = @transform_5, window_bounds = array<i64: 8, 32>}]} {
    %c0 = arith.constant 0 : index
    %c0_0 = arith.constant 0 : index
    %0 = vector.load %arg1[%c0, %c0_0] : memref<8x32xf32, #tpu.memory_space<vmem>>, vector<8x32xf32>
    %1 = arith.truncf %0 : vector<8x32xf32> to vector<8x32xbf16>
    %c0_1 = arith.constant 0 : index
    %c0_2 = arith.constant 0 : index
    %2 = vector.load %arg2[%c0_1, %c0_2] : memref<32x32xbf16, #tpu.memory_space<vmem>>, vector<32x32xbf16>
    %cst = arith.constant dense<0.000000e+00> : vector<8x32xf32>
    %3 = tpu.matmul %1, %2, %cst {dimension_numbers = #tpu.dot_dimension_numbers<[1], [0], [0], [1], [0, 0, 1, 1], [], []>} : vector<8x32xbf16>, vector<32x32xbf16>, vector<8x32xf32> -> vector<8x32xf32>
    %c0_3 = arith.constant 0 : index
    %c0_4 = arith.constant 0 : index
    %4 = vector.load %arg3[%c0_3, %c0_4] : memref<1x32xf32, #tpu.memory_space<vmem>>, vector<1x32xf32>
    %5 = vector.broadcast %4 : vector<1x32xf32> to vector<8x32xf32>
    %6 = arith.addf %3, %5 : vector<8x32xf32>
    %cst_5 = arith.constant 0.000000e+00 : f32
    %7 = vector.broadcast %cst_5 : f32 to vector<8x32xf32>
    %8 = arith.maximumf %6, %7 : vector<8x32xf32>
    %9 = arith.truncf %8 : vector<8x32xf32> to vector<8x32xbf16>
    %c0_6 = arith.constant 0 : index
    %c0_7 = arith.constant 0 : index
    %10 = vector.load %arg4[%c0_6, %c0_7] : memref<32x32xbf16, #tpu.memory_space<vmem>>, vector<32x32xbf16>
    %cst_8 = arith.constant dense<0.000000e+00> : vector<8x32xf32>
    %11 = tpu.matmul %9, %10, %cst_8 {dimension_numbers = #tpu.dot_dimension_numbers<[1], [0], [0], [1], [0, 0, 1, 1], [], []>} : vector<8x32xbf16>, vector<32x32xbf16>, vector<8x32xf32> -> vector<8x32xf32>
    %c0_9 = arith.constant 0 : index
    %c0_10 = arith.constant 0 : index
    %12 = vector.load %arg5[%c0_9, %c0_10] : memref<1x32xf32, #tpu.memory_space<vmem>>, vector<1x32xf32>
    %13 = vector.broadcast %12 : vector<1x32xf32> to vector<8x32xf32>
    %14 = arith.addf %11, %13 : vector<8x32xf32>
    %15 = arith.addf %0, %14 : vector<8x32xf32>
    %cst_11 = arith.constant 0.000000e+00 : f32
    %16 = vector.broadcast %cst_11 : f32 to vector<8x32xf32>
    %17 = arith.maximumf %15, %16 : vector<8x32xf32>
    %c0_12 = arith.constant 0 : index
    %c0_13 = arith.constant 0 : index
    %18 = vector.load %arg6[%c0_12, %c0_13] : memref<8x32xf32, #tpu.memory_space<vmem>>, vector<8x32xf32>
    tpu.vector_store %arg6[%c0_12, %c0_13], %17 {strides = array<i32>} : memref<8x32xf32, #tpu.memory_space<vmem>>, vector<8x32xf32>,
    return
  }
  func.func @transform_0(%arg0: i32) -> (i32, i32) {
    %c0_i32 = arith.constant 0 : i32
    %c0_i32_0 = arith.constant 0 : i32
    return %arg0, %c0_i32 : i32, i32
  }
  func.func @transform_1(%arg0: i32) -> (i32, i32) {
    %c0_i32 = arith.constant 0 : i32
    %c0_i32_0 = arith.constant 0 : i32
    %c0_i32_1 = arith.constant 0 : i32
    return %c0_i32, %c0_i32_0 : i32, i32
  }
  func.func @transform_2(%arg0: i32) -> (i32, i32) {
    %c0_i32 = arith.constant 0 : i32
    %c0_i32_0 = arith.constant 0 : i32
    %c0_i32_1 = arith.constant 0 : i32
    return %c0_i32, %c0_i32_0 : i32, i32
  }
  func.func @transform_3(%arg0: i32) -> (i32, i32) {
    %c0_i32 = arith.constant 0 : i32
    %c0_i32_0 = arith.constant 0 : i32
    %c0_i32_1 = arith.constant 0 : i32
    return %c0_i32, %c0_i32_0 : i32, i32
  }
  func.func @transform_4(%arg0: i32) -> (i32, i32) {
    %c0_i32 = arith.constant 0 : i32
    %c0_i32_0 = arith.constant 0 : i32
    %c0_i32_1 = arith.constant 0 : i32
    return %c0_i32, %c0_i32_0 : i32, i32
  }
  func.func @transform_5(%arg0: i32) -> (i32, i32) {
    %c0_i32 = arith.constant 0 : i32
    %c0_i32_0 = arith.constant 0 : i32
    return %arg0, %c0_i32 : i32, i32
  }
}

</mosaic_0001>

<bundles_post_ra>
// kernel: tpu_custom_call.1
= control target key start
LH: loop header
LB: loop body
LE: loop exit
PB: predicated region body
PF: predicated region fallthrough
CT: control target
= control target key end

     0   :  { %6 = vsyncpa [#allocation3], 0  ;;  %s102_s0 = inlined_call_operand.hbm [shape: f32[8,128], index: 0, kind: input, shape index: {}]   ;;  %s103_s1 = inlined_call_operand.hbm [shape: f32[8,128], index: 1, kind: output, shape index: {}]  }
   0x1   :  { %7 = vsyncpa [#allocation4], 0  ;;  %s84_s6 = smov [#allocation2]  }
   0x2   :  { %s14_s7 = sshll.u32 %s84_s6, 4  ;;  %s15_s7 = int_to_ptr.vmem [resolvable:$true] %s14_s7 }
   0x3   :  { %s48_s8 = scalar_lea.vmem %s15_s7, 128  ;;  %p53_p1 = scmp.lt.s32.totalorder %s15_s7, %s15_s7 }
   0x4   :  { %p49_p0 = scmp.ne.s32.totalorder %s15_s7, %s48_s8  ;;  %p54_p2 = scmp.lt.s32.totalorder %s48_s8, %s48_s8 }
   0x6   :  { %p55_p3 = por %p54_p2, %p53_p1 }
   0x8   :  { %p56_p4 = pnand %p55_p3, %p49_p0 }
   0xa   :  { %59 = shalt.err (!%p56_p4)
}
   0xb   :  { %17 = dma.hbm_to_vmem [thread:$0]  %s102_s0, 128, %s15_s7, [#allocation3]  }
   0xc   :  { %80 = dma.done.wait [#allocation3], 128  }
   0xd   :  { %81 = vsyncadd [#allocation3], 4294967168  ;;  %s85_s11 = smov [#allocation5]   ;;  %v21_v0 = vld [vmem:[#allocation2] sm:$0xff] }
   0xe   :  { %s29_s12 = sshll.u32 %s85_s11, 4  ;;  %22 = vst [vmem:[#allocation5] sm:$0xff] %v21_v0  ;;  %s30_s12 = int_to_ptr.vmem [resolvable:$true] %s29_s12 }
   0xf   :  { %s60_s13 = scalar_lea.vmem %s30_s12, 128  ;;  %p65_p6 = scmp.lt.s32.totalorder %s30_s12, %s30_s12 }
  0x10   :  { %p61_p5 = scmp.ne.s32.totalorder %s30_s12, %s60_s13  ;;  %p66_p7 = scmp.lt.s32.totalorder %s60_s13, %s60_s13 }
  0x12   :  { %p67_p8 = por %p66_p7, %p65_p6 }
  0x14   :  { %p68_p9 = pnand %p67_p8, %p61_p5 }
  0x16   :  { %71 = shalt.err (!%p68_p9)
}
  0x17   :  { %32 = dma.vmem_to_hbm [thread:$0]  %s30_s12, 128, %s103_s1, [#allocation4]  }
  0x18   :  { %82 = dma.done.wait [#allocation4], 128  }
  0x19   :  { %83 = vsyncadd [#allocation4], 4294967168 }
  0x1a   :  { %36 = vsyncpa [#allocation3], 1 }
  0x1b   :  { %37 = vsyncpa [#allocation4], 1 }

// kernel: tpu_custom_call.1
= control target key start
LH: loop header
LB: loop body
LE: loop exit
PB: predicated region body
PF: predicated region fallthrough
CT: control target
= control target key end

     0   :  { %10 = vsyncpa [#allocation3], 0  ;;  %s1006_s0 = inlined_call_operand.hbm [shape: f32[16,32], index: 0, kind: input, shape index: {}]   ;;  %s1007_s1 = inlined_call_operand.hbm [shape: bf16[32,32], index: 1, kind: input, shape index: {}]   ;;  %s1008_s2 = inlined_call_operand.vmem [shape: f32[1,32], index: 2, kind: input, shape index: {}]   ;;  %s1009_s3 = inlined_call_operand.hbm [shape: bf16[32,32], index: 3, kind: input, shape index: {}]   ;;  %s1010_s4 = inlined_call_operand.vmem [shape: f32[1,32], index: 4, kind: input, shape index: {}]   ;;  %s1011_s5 = inlined_call_operand.hbm [shape: f32[16,32], index: 5, kind: output, shape index: {}]  }
   0x1   :  { %12 = vsyncpa [#allocation3 + $0x1], 0 }
   0x2   :  { %13 = vsyncpa [#allocation6], 0 }
   0x3   :  { %14 = vsyncpa [#allocation4], 0 }
   0x4   :  { %16 = vsyncpa [#allocation4 + $0x1], 0  ;;  %s822_s18 = smov 0   ;;  %s824_s19 = smov 0  }
   0x5   :  { %s826_s20 = smov 0   ;;  %s828_s21 = smov 0  }
   0x6 LB: > { %s843_s22 = sadd.s32 4294967295, %s782_s21   ;;  %s513_s23 = sadd.s32 4294967294, %s782_s21   ;;  %s782_s21 = sphi %s828_s21, %s1033_s21   ;;  %s778_s20 = sphi %s826_s20, %s1032_s20   ;;  %s774_s19 = sphi %s824_s19, %s1031_s19   ;;  %s770_s18 = sphi %s822_s18, %s1030_s18  }
   0x7   : > { %p42_p0 = scmp.ne.s32.totalorder %s774_s19, %s770_s18  ;;  %p1012_p1 = scmp.eq.s32.totalorder %s843_s22, 0 }
   0x8   : > { %p156_p3 = scmp.eq.s32.totalorder %s513_s23, 1  ;;  %p514_p5 = scmp.ge.s32.totalorder %s782_s21, 1 }
   0x9   : > { %p852_p4 = por %p1012_p1, %p42_p0  ;;  %p163_p7 = scmp.lt.s32.totalorder %s782_s21, 3 }
   0xa   : > { %p857_p6 = por %p156_p3, %p42_p0  ;;  %s784_s27 = smov [#allocation5]  }
   0xb   : > { %s1016_s24 = scalar_select %p852_p4, 1, 0 }
   0xc   : > { %s1017_s25 = scalar_select %p857_p6, 1, 0 }
   0xd   : > { %p862_p8 = pnand %p514_p5, %p163_p7  ;;  %s175_s28 = sshll.u32 %s784_s27, 4  ;;  %s176_s28 = int_to_ptr.vmem [resolvable:$true] %s175_s28 }
   0xe   : > { %s785_s30 = smov [#allocation7]   ;;  %s645_s7 = scalar_lea.vmem %s176_s28, 256 }
   0xf   : > { %s1018_s26 = scalar_select %p862_p8, 1, 0 }
  0x10   : > { %p571_p9 = pneg %p862_p8  ;;  %s191_s6 = sshll.u32 %s785_s30, 4  ;;  %s192_s6 = int_to_ptr.vmem [resolvable:$true] %s191_s6 }
  0x11   : > { %p646_p13 = scmp.ne.s32.totalorder %s176_s28, %s645_s7  ;;  %p653_p5 = scmp.lt.s32.totalorder %s176_s28, %s176_s28 }
  0x12   : > { %p871_p11 = pnand %p571_p9, %p1012_p1  ;;  %p654_p7 = scmp.lt.s32.totalorder %s645_s7, %s645_s7 }
  0x14   : > { %p636_p12 = pneg %p871_p11  ;;  %p655_p10 = por %p654_p7, %p653_p5 }
  0x16   : > { %p648_p0 = pnand %p646_p13, %p636_p12 }
  0x18   : > { %p649_p3 = pneg %p648_p0 }
  0x1a   : > { %p656_p9 = pnand %p655_p10, %p649_p3 }
  0x1c   : > { %659 = shalt.err (!%p656_p9)
}
  0x1d   : > { %s786_s8 = smov 64   ;;  %s787_s9 = smov 4  }
  0x1e   : > { %574 = dma.hbm_to_vmem [thread:$0]  (!%p871_p11), %s1007_s1, 256, %s176_s28, [#allocation6], %s786_s8, %s786_s8, %s787_s9  }
  0x1f   : > { %s671_s12 = scalar_lea.vmem %s192_s6, 256  ;;  %p679_p2 = scmp.lt.s32.totalorder %s192_s6, %s192_s6 }
  0x20   : > { %p672_p1 = scmp.ne.s32.totalorder %s192_s6, %s671_s12  ;;  %p680_p6 = scmp.lt.s32.totalorder %s671_s12, %s671_s12 }
  0x22   : > { %p674_p13 = pnand %p672_p1, %p636_p12  ;;  %p681_p5 = por %p680_p6, %p679_p2 }
  0x24   : > { %p675_p0 = pneg %p674_p13 }
  0x26   : > { %p682_p10 = pnand %p681_p5, %p675_p0 }
  0x28   : > { %685 = shalt.err (!%p682_p10)
}
  0x29   : > { %577 = dma.hbm_to_vmem [thread:$0]  (!%p871_p11), %s1009_s3, 256, %s192_s6, [#allocation6], %s786_s8, %s786_s8, %s787_s9  }
  0x2a   : > { %s894_s15 = sadd.s32 1, %s782_s21   ;;  %s29_s16 = sadd.s32 1, %s778_s20 }
  0x2b   : > { %s26_s17 = ssub.s32 %s782_s21, %s894_s15  ;;  %p36_p1 = scmp.ne.s32.totalorder %s778_s20, %s774_s19 }
  0x2c   : > { %p27_p2 = scmp.eq.s32.totalorder %s26_s17, 0  ;;  %p37_p6 = scmp.eq.s32.totalorder %s782_s21, 0 }
  0x2d   : > { %p1020_p12 = scmp.eq.s32.totalorder %s843_s22, 1  ;;  %p588_p7 = scmp.lt.s32.totalorder %s782_s21, 2 }
  0x2e   : > { %s910_s27 = scalar_select %p27_p2, %s778_s20, %s29_s16  }
  0x2f   : > { %p904_p3 = por %p1020_p12, %p36_p1  ;;  %p38_p9 = por %p37_p6, %p36_p1 }
  0x30   : > { %s208_s28 = sand.u32 1, %s778_s20   ;;  %s519_s30 = sshll.u32 %s782_s21, 7 }
  0x31   : > { %s1021_s23 = scalar_select %p904_p3, 1, 0 }
  0x32   : > { %s518_s29 = sshll.u32 %s208_s28, 3  ;;  %s917_s8 = scalar_lea.hbm %s1006_s0, %s519_s30 }
  0x33   : > { %s212_s9 = scalar_lea.vmem [#allocation2], %s518_s29  ;;  %p919_p11 = pnand %p588_p7, %p38_p9 }
  0x34   : > { %s219_s10 = sshll.u32 %s212_s9, 4  ;;  %s209_s12 = scalar_lea.sflag [#allocation3], %s208_s28  ;;  %s220_s10 = int_to_ptr.vmem [resolvable:$true] %s219_s10 }
  0x35   : > { %s686_s13 = scalar_lea.hbm %s917_s8, 128  ;;  %p688_p0 = pneg %p919_p11 }
  0x36   : > { %p687_p13 = scmp.ne.s32.totalorder %s917_s8, %s686_s13  ;;  %s691_s17 = scalar_lea.hbm %s1006_s0, 256 }
  0x37   : > { %p692_p1 = scmp.lt.s32.totalorder %s917_s8, %s1006_s0  ;;  %p693_p2 = scmp.lt.s32.totalorder %s691_s17, %s686_s13 }
  0x38   : > { %p689_p5 = pnand %p688_p0, %p687_p13 }
  0x39   : > { %p694_p6 = por %p693_p2, %p692_p1 }
  0x3a   : > { %p690_p10 = pneg %p689_p5 }
  0x3c   : > { %p695_p12 = pnand %p694_p6, %p690_p10 }
  0x3e   : > { %698 = shalt.err (!%p695_p12)
}
  0x3f   : > { %s699_s6 = scalar_lea.vmem %s220_s10, 128  ;;  %s788_s28 = smov [#allocation2]  }
  0x40   : > { %p700_p7 = scmp.ne.s32.totalorder %s220_s10, %s699_s6  ;;  %s704_s7 = sshll.u32 %s788_s28, 4  ;;  %s705_s7 = int_to_ptr.vmem [resolvable:$false] %s704_s7 }
  0x41   : > { %s706_s9 = scalar_lea.vmem %s705_s7, 256  ;;  %p707_p13 = scmp.lt.s32.totalorder %s220_s10, %s705_s7 }
  0x42   : > { %p702_p9 = pnand %p700_p7, %p688_p0  ;;  %p708_p5 = scmp.lt.s32.totalorder %s706_s9, %s699_s6 }
  0x44   : > { %p703_p3 = pneg %p702_p9  ;;  %p709_p4 = por %p708_p5, %p707_p13 }
  0x46   : > { %p710_p8 = pnand %p709_p4, %p703_p3 }
  0x48   : > { %713 = shalt.err (!%p710_p8)
}
  0x49   : > { %581 = dma.hbm_to_vmem [thread:$0]  (!%p919_p11), %s917_s8, 128, %s220_s10, %s209_s12  }
  0x4a   : > { %p1023_p10 = scmp.ne.s32.totalorder %s1018_s26, 0 }
  0x4b   : > { %s940_s13 = sand.u32 (!%p1023_p10), 1, %s774_s19   ;;  %p1024_p4 = scmp.ne.s32.totalorder (!%p1023_p10), %s1016_s24, 0 }
  0x4c   : > { %228 = sbr.rel (%p1023_p10) target bundleno = 506 (0x1fa), region = 40  ;;  %s521_s14 = sshll.u32 (!%p1023_p10), %s940_s13, 3 }
  0x4d   : > { %s231_s16 = scalar_lea.sflag (!%p1023_p10), [#allocation3], %s940_s13  ;;  %s234_s17 = scalar_lea.vmem (!%p1023_p10), [#allocation2], %s521_s14 }
  0x51   : > { %757 = dma.done.wait (%p1024_p4), %s231_s16, 128  }
  0x52   : > { %759 = vsyncadd (%p1024_p4), %s231_s16, 4294967168  ;;  %p1025_p8 = scmp.eq.s32.totalorder %s843_s22, 0 }
  0x54   : > { %761 = dma.done.wait (%p1025_p8), [#allocation6], 512   ;;  %p1026_p3 = pmov %p1025_p8 }
  0x55   : > { %v789_v0 = vmov 0.0   ;;  %vm790_vm0 = vmmov 0   ;;  %v630_v1 = vld [vmem:[#allocation5 + $0x8] sm:$0xff]   ;;  %v631_v2 = vld [vmem:[#allocation5] sm:$0xff]   ;;  %v270_v3 = vld [vmem:[%s234_s17] sm:$0xff]  ;;  %vm295_vm1 = vcmask 261120  }
  0x56   : > { %763 = vsyncadd (%p1026_p3), [#allocation6], 4294966784  ;;  %543 = vmatprep.subr.bf16.mxu0 %v789_v0  ;;  %547 = vmatprep.mubr.msk.bf16.mxu0 %vm790_vm0, %v789_v0  ;;  %v271_v4 = vpack.c.bf16 %v270_v3, %v270_v3  ;;  %v632_v5 = vld [vmem:[#allocation7 + $0x8] sm:$0xff]   ;;  %v633_v6 = vld [vmem:[#allocation7] sm:$0xff]   ;;  %s534_s11 = sshll.u32 %s843_s22, 7  ;;  %s268_s12 = scalar_lea.vmem [#allocation8], %s521_s14 }
  0x57   : > { %551 = vmatprep.subr.bf16.mxu1 %v789_v0  ;;  %555 = vmatprep.mubr.msk.bf16.mxu1 %vm790_vm0, %v789_v0  ;;  %v525_v7 = vld [vmem:[%s1008_s2] ss:$0 sm:$0xff]  ;;  %s424_s30 = sshll.u32 %s268_s12, 4  ;;  %s968_s28 = scalar_lea.hbm %s1011_s5, %s534_s11  ;;  %s425_s30 = int_to_ptr.vmem [resolvable:$true] %s424_s30 }
  0x58   : > { %544 = vmatpush3.bf16.msra.mxu0 %v630_v1  ;;  %552 = vmatpush3.bf16.msra.mxu1 %v632_v5  ;;  %v529_v15 = vld [vmem:[%s1010_s4] ss:$0 sm:$0xff]  ;;  %s411_s7 = scalar_lea.sflag [#allocation4], %s940_s13  ;;  %s714_s9 = scalar_lea.vmem %s425_s30, 128 }
  0x59   : > { %545 = vmatprep.subr.bf16.mxu0 %v789_v0  ;;  %553 = vmatprep.subr.bf16.mxu1 %v789_v0  ;;  %p715_p11 = scmp.ne.s32.totalorder %s425_s30, %s714_s9  ;;  %p1027_p0 = scmp.ne.s32.totalorder %s1021_s23, 0 }
  0x5a   : > { %s791_s22 = smov [#allocation8]  }
  0x5b   : > { %p716_p1 = pnand %p715_p11, %p1027_p0  ;;  %s718_s14 = sshll.u32 %s791_s22, 4  ;;  %s719_s14 = int_to_ptr.vmem [resolvable:$false] %s718_s14 }
  0x5c   : > { %546 = vmatpush3.bf16.msra.mxu0 %v631_v2  ;;  %554 = vmatpush3.bf16.msra.mxu1 %v633_v6  ;;  %s720_s16 = scalar_lea.vmem %s719_s14, 256  ;;  %p721_p6 = scmp.lt.s32.totalorder %s425_s30, %s719_s14 }
  0x5d   : > { %p717_p2 = pneg %p716_p1  ;;  %p722_p12 = scmp.lt.s32.totalorder %s720_s16, %s714_s9 }
  0x5f   : > { %548 = vmatmul.mubr.msk.bf16.vlgmr.msra.gmra.mxu0 %vm295_vm1, %v271_v4  ;;  %p723_p7 = por %p722_p12, %p721_p6 }
  0x61   : > { %p724_p9 = pnand %p723_p7, %p717_p2 }
 0x11f   : > { %v333_v8 = vpop.f32.mrf.mxu0 }
 0x120   : > { %v334_v9 = vadd.f32 %v525_v7, %v333_v8 }
 0x121   : > { %v549_v10 = vpop.f32.mrf.mxu0 }
 0x122   : > { %v339_v11 = vmax.f32 %v334_v9, 0.0 }
 0x123   : > { %v336_v12 = vpop.f32.mrf.mxu0 }
 0x124   : > { %v340_v13 = vpack.c.bf16 %v339_v11, %v339_v11 }
 0x125   : > { %v550_v14 = vpop.f32.mrf.mxu0 }
 0x126   : > { %556 = vmatmul.mubr.msk.bf16.vlgmr.msra.gmra.mxu1 %vm295_vm1, %v340_v13 }
 0x1e6   : > { %v401_v16 = vpop.f32.mrf.mxu1 }
 0x1e7   : > { %v402_v17 = vadd.f32 %v529_v15, %v401_v16 }
 0x1e8   : > { %v557_v18 = vpop.f32.mrf.mxu1 }
 0x1e9   : > { %v407_v19 = vadd.f32 %v402_v17, %v270_v3 }
 0x1ea   : > { %v404_v20 = vpop.f32.mrf.mxu1 }
 0x1eb   : > { %v408_v21 = vmax.f32 %v407_v19, 0.0 }
 0x1ec   : > { %v558_v22 = vpop.f32.mrf.mxu1 }
 0x1ed   : > { %409 = vst.msk [vmem:[%s268_s12] sm:$0xff] %vm295_vm1, %v408_v21 }
 0x1ee   : > { %727 = shalt.err (!%p724_p9)
}
 0x1ef   : > { %s728_s17 = scalar_lea.hbm %s968_s28, 128  ;;  %s732_s26 = scalar_lea.hbm %s1011_s5, 256 }
 0x1f0   : > { %p729_p13 = scmp.ne.s32.totalorder %s968_s28, %s728_s17  ;;  %p733_p4 = scmp.lt.s32.totalorder %s968_s28, %s1011_s5 }
 0x1f1   : > { %p734_p8 = scmp.lt.s32.totalorder %s732_s26, %s728_s17 }
 0x1f2   : > { %p730_p5 = pnand %p729_p13, %p1027_p0 }
 0x1f3   : > { %p735_p3 = por %p734_p8, %p733_p4 }
 0x1f4   : > { %p731_p10 = pneg %p730_p5 }
 0x1f6   : > { %p736_p11 = pnand %p735_p3, %p731_p10 }
 0x1f8   : > { %739 = shalt.err (!%p736_p11)
}
 0x1f9   : > { %569 = dma.vmem_to_hbm [thread:$0]  (%p1027_p0), %s425_s30, 128, %s968_s28, %s411_s7  }
 0x1fa PF: > { %s436_s11 = sand.u32 1, %s770_s18   ;;  %p1028_p1 = scmp.ne.s32.totalorder %s1017_s25, 0 }
 0x1fb   : > { %p1029_p2 = scmp.ge.s32.totalorder %s782_s21, 2  ;;  %s437_s12 = scalar_lea.sflag [#allocation4], %s436_s11 }
 0x1fd   : > { %p583_p6 = pnand %p1029_p2, %p1028_p1 }
 0x1ff   : > { %p584_p12 = pneg %p583_p6 }
 0x201   : > { %765 = dma.done.wait (%p584_p12), %s437_s12, 128  }
 0x202   : > { %767 = vsyncadd (%p584_p12), %s437_s12, 4294967168  ;;  %p19_p7 = scmp.ge.s32.totalorder %s894_s15, 4   ;;  %s1030_s18 = smov %s774_s19 }
 0x203   : > { %s1031_s19 = smov %s778_s20  ;;  %s1032_s20 = smov %s910_s27 }
 0x204   : > { %s1033_s21 = smov %s894_s15  ;;  %21 = sbr.rel (!%p19_p7) target bundleno = 6 (0x6), region = 93 }
 0x209   :  { %442 = vsyncpa [#allocation3], 1 }
 0x20a   :  { %444 = vsyncpa [#allocation3 + $0x1], 1 }
 0x20b   :  { %445 = vsyncpa [#allocation6], 1 }
 0x20c   :  { %446 = vsyncpa [#allocation4], 1 }
 0x20d   :  { %448 = vsyncpa [#allocation4 + $0x1], 1 }

</bundles_post_ra>
